<compile_context>
chip_gen: v7x
topology: tpu7x:2x2x1
jax: 0.10.0
libtpu: 0.0.40
codegen_flags: <defaults>
</compile_context>

<pallas_src>
import functools

import jax
import jax.numpy as jnp
from jax.experimental import pallas as pl
from jax.experimental.pallas import tpu as pltpu

IGNORE_INDEX = 255
SMOOTH = 1.0  # BinaryDiceLoss defaults: smooth=1, p=2


def _task_loss_kernel(logits_ref, tgt_ref, out_ref,
                      inter_acc, psq_acc, tsq_acc, ce_acc, cnt_acc,
                      *, hw, tile, num_classes, ignore_index, has_tail):
    j = pl.program_id(2)

    @pl.when(j == 0)
    def _():
        inter_acc[...] = jnp.zeros_like(inter_acc)
        psq_acc[...] = jnp.zeros_like(psq_acc)
        tsq_acc[...] = jnp.zeros_like(tsq_acc)
        ce_acc[...] = jnp.zeros_like(ce_acc)
        cnt_acc[...] = jnp.zeros_like(cnt_acc)

    t = tgt_ref[0]                                   # [1, T] int32
    valid = t != ignore_index                        # [1, T] bool
    if has_tail:
        # Static branch: only compiled in when hw % tile != 0.  Cheap [1, T]
        # work that masks the stale lanes of the (single) partial tail tile.
        global_j = pl.program_id(0) * pl.num_programs(2) + j
        lane = jax.lax.broadcasted_iota(jnp.int32, (1, tile), 1)
        valid = valid & ((global_j * tile + lane) < hw)

    validf = valid.astype(jnp.float32)               # [1, T]
    # Invalid / stale pixels get a nonexistent class -> their one-hot row is
    # all zero; no [C, T] logit scrub needed.
    tc = jnp.where(valid, t, num_classes)            # [1, T]

    x = logits_ref[0].astype(jnp.float32)            # [C, T] (per-tile upcast)
    m = jnp.max(x, axis=0, keepdims=True)            # [1, T]
    e = jnp.exp(x - m)                               # [C, T]  (EUP)
    s = jnp.sum(e, axis=0, keepdims=True)            # [1, T]
    inv_s = pl.reciprocal(s, approx=True)            # EUP slot, ~12-bit
    inv_s = inv_s * (2.0 - s * inv_s)                # one Newton step -> ~f32
    p = e * inv_s                                    # [C, T] softmax probs

    cls = jax.lax.broadcasted_iota(jnp.int32, (num_classes, tile), 0)
    onehot = cls == tc                                # [C, T] bool (valid only)

    # Per-tile lane reductions straight into tiny [C,1] / [1,1] accumulators
    # (no big read-modify-write slabs, no big zero-init).
    inter_acc[...] += jnp.sum(jnp.where(onehot, p, 0.0), axis=1, keepdims=True)
    psq_acc[...] += jnp.sum(jnp.where(valid, p * p, 0.0), axis=1, keepdims=True)
    tsq_acc[...] += jnp.sum(onehot.astype(jnp.float32), axis=1, keepdims=True)

    # Cross-entropy without materializing log-softmax:
    # -log softmax(x)[target] = m + log(sum exp) - x[target]
    x_t = jnp.sum(jnp.where(onehot, x, 0.0), axis=0, keepdims=True)   # [1, T]
    ce_row = jnp.where(valid, m + jnp.log(s) - x_t, 0.0)              # [1, T]
    ce_acc[...] += jnp.sum(ce_row, axis=1, keepdims=True)
    cnt_acc[...] += jnp.sum(validf, axis=1, keepdims=True)

    @pl.when(j == pl.num_programs(2) - 1)
    def _():
        ci = jax.lax.broadcasted_iota(jnp.int32, (num_classes, 1), 0)
        misc = (jnp.where(ci == 0, ce_acc[...], 0.0)
                + jnp.where(ci == 1, cnt_acc[...], 0.0))              # [C, 1]
        col = jax.lax.broadcasted_iota(jnp.int32, (num_classes, 4), 1)
        out_ref[0, 0] = (jnp.where(col == 0, inter_acc[...], 0.0)
                         + jnp.where(col == 1, psq_acc[...], 0.0)
                         + jnp.where(col == 2, tsq_acc[...], 0.0)
                         + jnp.where(col == 3, misc, 0.0))


def _pick_tile(hw, max_tile):
    """Pick a lane-aligned pixel tile; prefer one that divides hw exactly so
    the per-lane tail mask compiles out (static)."""
    if hw <= max_tile:
        return hw                                  # full-extent block, legal
    t = (max_tile // 128) * 128
    assert t >= 128, "tile_pixels must be >= 128"
    t_min = max(128, t // 4)
    tt = t
    while tt >= t_min:
        if hw % tt == 0:
            return tt
        tt -= 128
    return t                                       # tail tile masked in-kernel


def task_loss(predict, target, *, num_classes=11, ignore_index=IGNORE_INDEX,
              tile_pixels=32768):
    """predict: [N, C, H, W] logits (any float dtype); target: [N, H, W] int."""
    n, c, h, w = predict.shape
    assert target.shape == (n, h, w)
    assert c == num_classes
    assert num_classes >= 2
    hw = h * w

    # TODO(synk): the PyTorch module F.interpolate()s `target` when its spatial
    # size differs from `predict`; we assume matching sizes here.

    # Free reshapes only: no NCHW->NHWC transpose, no padding, no dtype cast of
    # the logits (the kernel upcasts per tile in VMEM).
    x = predict.reshape(n, c, hw)
    t = target.reshape(n, 1, hw).astype(jnp.int32)

    tile = _pick_tile(hw, tile_pixels)
    assert tile == hw or tile % 128 == 0
    num_tiles = pl.cdiv(hw, tile)
    has_tail = (hw % tile) != 0

    # Second 'parallel' axis over pixel halves: keeps both v7x TensorCores
    # busy even at batch size 1 (pure re-ordering on single-core chips).
    n_splits = 2 if (num_tiles % 2 == 0 and num_tiles >= 2) else 1
    tps = num_tiles // n_splits

    kernel = functools.partial(_task_loss_kernel, hw=hw, tile=tile,
                               num_classes=num_classes,
                               ignore_index=ignore_index, has_tail=has_tail)

    partials = pl.pallas_call(
        kernel,
        out_shape=jax.ShapeDtypeStruct((n_splits, n, num_classes, 4),
                                       jnp.float32),
        grid_spec=pltpu.PrefetchScalarGridSpec(
            num_scalar_prefetch=0,
            grid=(n_splits, n, tps),
            in_specs=[
                pl.BlockSpec((1, c, tile), lambda s, b, j: (b, 0, s * tps + j)),
                pl.BlockSpec((1, 1, tile), lambda s, b, j: (b, 0, s * tps + j)),
            ],
            out_specs=pl.BlockSpec((1, 1, num_classes, 4),
                                   lambda s, b, j: (s, b, 0, 0)),
            scratch_shapes=[
                pltpu.VMEM((num_classes, 1), jnp.float32),  # sum p * onehot
                pltpu.VMEM((num_classes, 1), jnp.float32),  # sum p^2 (valid)
                pltpu.VMEM((num_classes, 1), jnp.float32),  # sum onehot
                pltpu.VMEM((1, 1), jnp.float32),            # CE numerator
                pltpu.VMEM((1, 1), jnp.float32),            # valid-pixel count
            ],
        ),
        compiler_params=pltpu.CompilerParams(
            dimension_semantics=("parallel", "parallel", "arbitrary"),
            vmem_limit_bytes=48 * 1024 * 1024),
    )(x, t)

    # Tiny [splits, N, C, 4] partials -> scalar loss.
    inter = jnp.sum(partials[..., 0], axis=(0, 1))     # [C]
    psq = jnp.sum(partials[..., 1], axis=(0, 1))       # [C]
    tsq = jnp.sum(partials[..., 2], axis=(0, 1))       # [C]
    ce_sum = jnp.sum(partials[:, :, 0, 3])
    cnt = jnp.sum(partials[:, :, 1, 3])

    dice = jnp.sum(1.0 - (2.0 * inter + SMOOTH) / (psq + tsq + SMOOTH)) / num_classes
    ce = ce_sum / cnt   # NaN iff every pixel is ignore_index (matches reference)
    return dice + ce


def _reference_task_loss(predict, target, num_classes=11, ignore_index=IGNORE_INDEX):
    """Pure-JAX reference mirroring the PyTorch TaskLoss semantics."""
    mask = (target != ignore_index)
    maskf = mask.astype(jnp.float32)[:, None]                   # [N,1,H,W]
    tc = jnp.where(mask, target, 0)
    onehot = jax.nn.one_hot(tc, num_classes, axis=1) * maskf    # [N,C,H,W]
    probs = jax.nn.softmax(predict, axis=1) * maskf
    inter = jnp.sum(probs * onehot, axis=(0, 2, 3))
    psq = jnp.sum(probs * probs, axis=(0, 2, 3))
    tsq = jnp.sum(onehot, axis=(0, 2, 3))
    dice = jnp.sum(1.0 - (2.0 * inter + SMOOTH) / (psq + tsq + SMOOTH)) / num_classes
    logp = jax.nn.log_softmax(predict, axis=1)
    ce = jnp.sum(onehot * (-logp)) / jnp.sum(maskf)
    return dice + ce


if __name__ == "__main__":
    key = jax.random.PRNGKey(0)
    k1, k2, k3 = jax.random.split(key, 3)

    # Test 1: f32 logits, single-tile path (hw <= tile_pixels), jitted wrapper.
    N, C, H, W = 2, 11, 16, 16
    predict = jax.random.normal(k1, (N, C, H, W), dtype=jnp.float32)
    target = jax.random.randint(k2, (N, H, W), 0, C, dtype=jnp.int32)
    ignore_mask = jax.random.bernoulli(k3, 0.1, (N, H, W))
    target = jnp.where(ignore_mask, IGNORE_INDEX, target)

    loss_fn = jax.jit(functools.partial(task_loss, num_classes=C))
    loss = jax.block_until_ready(loss_fn(predict, target))
    ref = _reference_task_loss(predict, target, num_classes=C)
    assert jnp.allclose(loss, ref, rtol=1e-4, atol=1e-5), (loss, ref)

    # Test 2: bf16 logits, 4 tiles with a partial tail (hw=448, tile=128):
    # exercises the HW-split parallel axis AND the tail-mask path.
    H2, W2 = 16, 28
    k4, k5, k6 = jax.random.split(jax.random.PRNGKey(1), 3)
    predict2 = jax.random.normal(k4, (N, C, H2, W2), dtype=jnp.float32).astype(jnp.bfloat16)
    target2 = jax.random.randint(k5, (N, H2, W2), 0, C, dtype=jnp.int32)
    target2 = jnp.where(jax.random.bernoulli(k6, 0.1, (N, H2, W2)),
                        IGNORE_INDEX, target2)

    loss_fn2 = jax.jit(functools.partial(task_loss, num_classes=C, tile_pixels=128))
    loss2 = jax.block_until_ready(loss_fn2(predict2, target2))
    ref2 = _reference_task_loss(predict2.astype(jnp.float32), target2, num_classes=C)
    assert jnp.allclose(loss2, ref2, rtol=2e-4, atol=1e-4), (loss2, ref2)

    # Test 3: f32 logits, 3 tiles that divide hw exactly (hw=384, tile=128):
    # mask compiled out, odd tile count -> no HW split.
    H3, W3 = 16, 24
    k7, k8, k9 = jax.random.split(jax.random.PRNGKey(2), 3)
    predict3 = jax.random.normal(k7, (N, C, H3, W3), dtype=jnp.float32)
    target3 = jax.random.randint(k8, (N, H3, W3), 0, C, dtype=jnp.int32)
    target3 = jnp.where(jax.random.bernoulli(k9, 0.1, (N, H3, W3)),
                        IGNORE_INDEX, target3)

    loss_fn3 = jax.jit(functools.partial(task_loss, num_classes=C, tile_pixels=128))
    loss3 = jax.block_until_ready(loss_fn3(predict3, target3))
    ref3 = _reference_task_loss(predict3, target3, num_classes=C)
    assert jnp.allclose(loss3, ref3, rtol=1e-4, atol=1e-5), (loss3, ref3)

    print("KERNEL_OK")
</pallas_src>

<mosaic_0001>
module attributes {stable_mosaic.version = 11 : i64} {
  func.func @_task_loss_kernel(%arg0: i32, %arg1: i32, %arg2: i32, %arg3: memref<1x11x256xf32, #tpu.memory_space<vmem>>, %arg4: memref<1x1x256xi32, #tpu.memory_space<vmem>>, %arg5: memref<1x1x11x4xf32, #tpu.memory_space<vmem>>, %arg6: memref<11x1xf32, #tpu.memory_space<vmem>>, %arg7: memref<11x1xf32, #tpu.memory_space<vmem>>, %arg8: memref<11x1xf32, #tpu.memory_space<vmem>>, %arg9: memref<1x1xf32, #tpu.memory_space<vmem>>, %arg10: memref<1x1xf32, #tpu.memory_space<vmem>>) attributes {dimension_semantics = [#tpu.dimension_semantics<parallel>, #tpu.dimension_semantics<parallel>, #tpu.dimension_semantics<arbitrary>], iteration_bounds = array<i64: 1, 2, 1>, scalar_prefetch = 0 : i64, scratch_operands = 5 : i64, tpu.core_type = #tpu.core_type<tc>, window_params = [{transform_indices = @transform_0, window_bounds = array<i64: 1, 11, 256>}, {transform_indices = @transform_1, window_bounds = array<i64: 1, 1, 256>}, {transform_indices = @transform_2, window_bounds = array<i64: 1, 1, 11, 4>}]} {
    %c0_i32 = arith.constant 0 : i32
    %0 = arith.cmpi eq, %arg2, %c0_i32 : i32
    %1 = arith.extui %0 : i1 to i32
    %c0_i32_0 = arith.constant 0 : i32
    %2 = arith.cmpi ne, %1, %c0_i32_0 : i32
    scf.if %2 {
      %cst_40 = arith.constant 0.000000e+00 : f32
      %76 = vector.broadcast %cst_40 : f32 to vector<11x1xf32>
      %c0_41 = arith.constant 0 : index
      %c0_42 = arith.constant 0 : index
      %77 = vector.load %arg6[%c0_41, %c0_42] : memref<11x1xf32, #tpu.memory_space<vmem>>, vector<11x1xf32>
      tpu.vector_store %arg6[%c0_41, %c0_42], %76 {strides = array<i32>} : memref<11x1xf32, #tpu.memory_space<vmem>>, vector<11x1xf32>,
      %cst_43 = arith.constant 0.000000e+00 : f32
      %78 = vector.broadcast %cst_43 : f32 to vector<11x1xf32>
      %c0_44 = arith.constant 0 : index
      %c0_45 = arith.constant 0 : index
      %79 = vector.load %arg7[%c0_44, %c0_45] : memref<11x1xf32, #tpu.memory_space<vmem>>, vector<11x1xf32>
      tpu.vector_store %arg7[%c0_44, %c0_45], %78 {strides = array<i32>} : memref<11x1xf32, #tpu.memory_space<vmem>>, vector<11x1xf32>,
      %cst_46 = arith.constant 0.000000e+00 : f32
      %80 = vector.broadcast %cst_46 : f32 to vector<11x1xf32>
      %c0_47 = arith.constant 0 : index
      %c0_48 = arith.constant 0 : index
      %81 = vector.load %arg8[%c0_47, %c0_48] : memref<11x1xf32, #tpu.memory_space<vmem>>, vector<11x1xf32>
      tpu.vector_store %arg8[%c0_47, %c0_48], %80 {strides = array<i32>} : memref<11x1xf32, #tpu.memory_space<vmem>>, vector<11x1xf32>,
      %cst_49 = arith.constant 0.000000e+00 : f32
      %82 = vector.broadcast %cst_49 : f32 to vector<1x1xf32>
      %c0_50 = arith.constant 0 : index
      %c0_51 = arith.constant 0 : index
      %83 = vector.load %arg9[%c0_50, %c0_51] : memref<1x1xf32, #tpu.memory_space<vmem>>, vector<1x1xf32>
      tpu.vector_store %arg9[%c0_50, %c0_51], %82 {strides = array<i32>} : memref<1x1xf32, #tpu.memory_space<vmem>>, vector<1x1xf32>,
      %cst_52 = arith.constant 0.000000e+00 : f32
      %84 = vector.broadcast %cst_52 : f32 to vector<1x1xf32>
      %c0_53 = arith.constant 0 : index
      %c0_54 = arith.constant 0 : index
      %85 = vector.load %arg10[%c0_53, %c0_54] : memref<1x1xf32, #tpu.memory_space<vmem>>, vector<1x1xf32>
      tpu.vector_store %arg10[%c0_53, %c0_54], %84 {strides = array<i32>} : memref<1x1xf32, #tpu.memory_space<vmem>>, vector<1x1xf32>,
    } else {
    }
    %c0 = arith.constant 0 : index
    %c0_1 = arith.constant 0 : index
    %c0_2 = arith.constant 0 : index
    %3 = vector.load %arg4[%c0, %c0_1, %c0_2] : memref<1x1x256xi32, #tpu.memory_space<vmem>>, vector<1x1x256xi32>
    %4 = vector.shape_cast %3 : vector<1x1x256xi32> to vector<1x256xi32>
    %c255_i32 = arith.constant 255 : i32
    %5 = vector.broadcast %c255_i32 : i32 to vector<1x256xi32>
    %6 = arith.cmpi ne, %4, %5 : vector<1x256xi32>
    %7 = arith.extui %6 : vector<1x256xi1> to vector<1x256xi32>
    %8 = arith.sitofp %7 : vector<1x256xi32> to vector<1x256xf32>
    %c11_i32 = arith.constant 11 : i32
    %9 = vector.broadcast %c11_i32 : i32 to vector<1x256xi32>
    %10 = arith.select %6, %4, %9 : vector<1x256xi1>, vector<1x256xi32>
    %c0_3 = arith.constant 0 : index
    %c0_4 = arith.constant 0 : index
    %c0_5 = arith.constant 0 : index
    %11 = vector.load %arg3[%c0_3, %c0_4, %c0_5] : memref<1x11x256xf32, #tpu.memory_space<vmem>>, vector<1x11x256xf32>
    %12 = vector.shape_cast %11 : vector<1x11x256xf32> to vector<11x256xf32>
    %cst = arith.constant dense<0xFF800000> : vector<256xf32>
    %13 = vector.multi_reduction <maximumf>, %12, %cst [0] : vector<11x256xf32> to vector<256xf32>
    %14 = vector.shape_cast %13 : vector<256xf32> to vector<1x256xf32>
    %15 = vector.broadcast %14 : vector<1x256xf32> to vector<11x256xf32>
    %16 = arith.subf %12, %15 : vector<11x256xf32>
    %17 = math.exp %16 : vector<11x256xf32>
    %cst_6 = arith.constant dense<0.000000e+00> : vector<256xf32>
    %18 = vector.multi_reduction <add>, %17, %cst_6 [0] : vector<11x256xf32> to vector<256xf32>
    %19 = vector.shape_cast %18 : vector<256xf32> to vector<1x256xf32>
    %20 = tpu.reciprocal %19 {approx = true} : vector<1x256xf32> -> vector<1x256xf32>
    %21 = arith.mulf %19, %20 : vector<1x256xf32>
    %cst_7 = arith.constant 2.000000e+00 : f32
    %22 = vector.broadcast %cst_7 : f32 to vector<1x256xf32>
    %23 = arith.subf %22, %21 : vector<1x256xf32>
    %24 = arith.mulf %20, %23 : vector<1x256xf32>
    %25 = vector.broadcast %24 : vector<1x256xf32> to vector<11x256xf32>
    %26 = arith.mulf %17, %25 : vector<11x256xf32>
    %27 = tpu.iota {dimensions = array<i32: 0>} : vector<11x256xi32>
    %28 = vector.broadcast %10 : vector<1x256xi32> to vector<11x256xi32>
    %29 = arith.cmpi eq, %27, %28 : vector<11x256xi32>
    %c0_8 = arith.constant 0 : index
    %c0_9 = arith.constant 0 : index
    %30 = vector.load %arg6[%c0_8, %c0_9] : memref<11x1xf32, #tpu.memory_space<vmem>>, vector<11x1xf32>
    %cst_10 = arith.constant 0.000000e+00 : f32
    %31 = vector.broadcast %cst_10 : f32 to vector<11x256xf32>
    %32 = arith.select %29, %26, %31 : vector<11x256xi1>, vector<11x256xf32>
    %cst_11 = arith.constant dense<0.000000e+00> : vector<11xf32>
    %33 = vector.multi_reduction <add>, %32, %cst_11 [1] : vector<11x256xf32> to vector<11xf32>
    %34 = vector.shape_cast %33 : vector<11xf32> to vector<11x1xf32>
    %35 = arith.addf %30, %34 : vector<11x1xf32>
    %c0_12 = arith.constant 0 : index
    %c0_13 = arith.constant 0 : index
    %36 = vector.load %arg6[%c0_12, %c0_13] : memref<11x1xf32, #tpu.memory_space<vmem>>, vector<11x1xf32>
    tpu.vector_store %arg6[%c0_12, %c0_13], %35 {strides = array<i32>} : memref<11x1xf32, #tpu.memory_space<vmem>>, vector<11x1xf32>,
    %c0_14 = arith.constant 0 : index
    %c0_15 = arith.constant 0 : index
    %37 = vector.load %arg7[%c0_14, %c0_15] : memref<11x1xf32, #tpu.memory_space<vmem>>, vector<11x1xf32>
    %38 = arith.mulf %26, %26 : vector<11x256xf32>
    %cst_16 = arith.constant 0.000000e+00 : f32
    %39 = vector.shape_cast %6 : vector<1x256xi1> to vector<1x256xi1>
    %40 = vector.broadcast %39 : vector<1x256xi1> to vector<11x256xi1>
    %41 = vector.broadcast %cst_16 : f32 to vector<11x256xf32>
    %42 = arith.select %40, %38, %41 : vector<11x256xi1>, vector<11x256xf32>
    %cst_17 = arith.constant dense<0.000000e+00> : vector<11xf32>
    %43 = vector.multi_reduction <add>, %42, %cst_17 [1] : vector<11x256xf32> to vector<11xf32>
    %44 = vector.shape_cast %43 : vector<11xf32> to vector<11x1xf32>
    %45 = arith.addf %37, %44 : vector<11x1xf32>
    %c0_18 = arith.constant 0 : index
    %c0_19 = arith.constant 0 : index
    %46 = vector.load %arg7[%c0_18, %c0_19] : memref<11x1xf32, #tpu.memory_space<vmem>>, vector<11x1xf32>
    tpu.vector_store %arg7[%c0_18, %c0_19], %45 {strides = array<i32>} : memref<11x1xf32, #tpu.memory_space<vmem>>, vector<11x1xf32>,
    %c0_20 = arith.constant 0 : index
    %c0_21 = arith.constant 0 : index
    %47 = vector.load %arg8[%c0_20, %c0_21] : memref<11x1xf32, #tpu.memory_space<vmem>>, vector<11x1xf32>
    %48 = arith.extui %29 : vector<11x256xi1> to vector<11x256xi32>
    %49 = arith.sitofp %48 : vector<11x256xi32> to vector<11x256xf32>
    %cst_22 = arith.constant dense<0.000000e+00> : vector<11xf32>
    %50 = vector.multi_reduction <add>, %49, %cst_22 [1] : vector<11x256xf32> to vector<11xf32>
    %51 = vector.shape_cast %50 : vector<11xf32> to vector<11x1xf32>
    %52 = arith.addf %47, %51 : vector<11x1xf32>
    %c0_23 = arith.constant 0 : index
    %c0_24 = arith.constant 0 : index
    %53 = vector.load %arg8[%c0_23, %c0_24] : memref<11x1xf32, #tpu.memory_space<vmem>>, vector<11x1xf32>
    tpu.vector_store %arg8[%c0_23, %c0_24], %52 {strides = array<i32>} : memref<11x1xf32, #tpu.memory_space<vmem>>, vector<11x1xf32>,
    %cst_25 = arith.constant 0.000000e+00 : f32
    %54 = vector.broadcast %cst_25 : f32 to vector<11x256xf32>
    %55 = arith.select %29, %12, %54 : vector<11x256xi1>, vector<11x256xf32>
    %cst_26 = arith.constant dense<0.000000e+00> : vector<256xf32>
    %56 = vector.multi_reduction <add>, %55, %cst_26 [0] : vector<11x256xf32> to vector<256xf32>
    %57 = vector.shape_cast %56 : vector<256xf32> to vector<1x256xf32>
    %58 = math.log %19 : vector<1x256xf32>
    %59 = arith.addf %14, %58 : vector<1x256xf32>
    %60 = arith.subf %59, %57 : vector<1x256xf32>
    %cst_27 = arith.constant 0.000000e+00 : f32
    %61 = vector.broadcast %cst_27 : f32 to vector<1x256xf32>
    %62 = arith.select %6, %60, %61 : vector<1x256xi1>, vector<1x256xf32>
    %c0_28 = arith.constant 0 : index
    %c0_29 = arith.constant 0 : index
    %63 = vector.load %arg9[%c0_28, %c0_29] : memref<1x1xf32, #tpu.memory_space<vmem>>, vector<1x1xf32>
    %cst_30 = arith.constant dense<0.000000e+00> : vector<1xf32>
    %64 = vector.multi_reduction <add>, %62, %cst_30 [1] : vector<1x256xf32> to vector<1xf32>
    %65 = vector.shape_cast %64 : vector<1xf32> to vector<1x1xf32>
    %66 = arith.addf %63, %65 : vector<1x1xf32>
    %c0_31 = arith.constant 0 : index
    %c0_32 = arith.constant 0 : index
    %67 = vector.load %arg9[%c0_31, %c0_32] : memref<1x1xf32, #tpu.memory_space<vmem>>, vector<1x1xf32>
    tpu.vector_store %arg9[%c0_31, %c0_32], %66 {strides = array<i32>} : memref<1x1xf32, #tpu.memory_space<vmem>>, vector<1x1xf32>,
    %c0_33 = arith.constant 0 : index
    %c0_34 = arith.constant 0 : index
    %68 = vector.load %arg10[%c0_33, %c0_34] : memref<1x1xf32, #tpu.memory_space<vmem>>, vector<1x1xf32>
    %cst_35 = arith.constant dense<0.000000e+00> : vector<1xf32>
    %69 = vector.multi_reduction <add>, %8, %cst_35 [1] : vector<1x256xf32> to vector<1xf32>
    %70 = vector.shape_cast %69 : vector<1xf32> to vector<1x1xf32>
    %71 = arith.addf %68, %70 : vector<1x1xf32>
    %c0_36 = arith.constant 0 : index
    %c0_37 = arith.constant 0 : index
    %72 = vector.load %arg10[%c0_36, %c0_37] : memref<1x1xf32, #tpu.memory_space<vmem>>, vector<1x1xf32>
    tpu.vector_store %arg10[%c0_36, %c0_37], %71 {strides = array<i32>} : memref<1x1xf32, #tpu.memory_space<vmem>>, vector<1x1xf32>,
    %c0_i32_38 = arith.constant 0 : i32
    %73 = arith.cmpi eq, %arg2, %c0_i32_38 : i32
    %74 = arith.extui %73 : i1 to i32
    %c0_i32_39 = arith.constant 0 : i32
    %75 = arith.cmpi ne, %74, %c0_i32_39 : i32
    scf.if %75 {
      %76 = tpu.iota {dimensions = array<i32: 0>} : vector<11x1xi32>
      %c0_i32_40 = arith.constant 0 : i32
      %77 = vector.broadcast %c0_i32_40 : i32 to vector<11x1xi32>
      %78 = arith.cmpi eq, %76, %77 : vector<11x1xi32>
      %c0_41 = arith.constant 0 : index
      %c0_42 = arith.constant 0 : index
      %79 = vector.load %arg9[%c0_41, %c0_42] : memref<1x1xf32, #tpu.memory_space<vmem>>, vector<1x1xf32>
      %cst_43 = arith.constant 0.000000e+00 : f32
      %80 = vector.shape_cast %79 : vector<1x1xf32> to vector<1x1xf32>
      %81 = vector.broadcast %80 : vector<1x1xf32> to vector<11x1xf32>
      %82 = vector.broadcast %cst_43 : f32 to vector<11x1xf32>
      %83 = arith.select %78, %81, %82 : vector<11x1xi1>, vector<11x1xf32>
      %c1_i32 = arith.constant 1 : i32
      %84 = vector.broadcast %c1_i32 : i32 to vector<11x1xi32>
      %85 = arith.cmpi eq, %76, %84 : vector<11x1xi32>
      %c0_44 = arith.constant 0 : index
      %c0_45 = arith.constant 0 : index
      %86 = vector.load %arg10[%c0_44, %c0_45] : memref<1x1xf32, #tpu.memory_space<vmem>>, vector<1x1xf32>
      %cst_46 = arith.constant 0.000000e+00 : f32
      %87 = vector.shape_cast %86 : vector<1x1xf32> to vector<1x1xf32>
      %88 = vector.broadcast %87 : vector<1x1xf32> to vector<11x1xf32>
      %89 = vector.broadcast %cst_46 : f32 to vector<11x1xf32>
      %90 = arith.select %85, %88, %89 : vector<11x1xi1>, vector<11x1xf32>
      %91 = arith.addf %83, %90 : vector<11x1xf32>
      %92 = tpu.iota {dimensions = array<i32: 1>} : vector<11x4xi32>
      %c0_i32_47 = arith.constant 0 : i32
      %93 = vector.broadcast %c0_i32_47 : i32 to vector<11x4xi32>
      %94 = arith.cmpi eq, %92, %93 : vector<11x4xi32>
      %c0_48 = arith.constant 0 : index
      %c0_49 = arith.constant 0 : index
      %95 = vector.load %arg6[%c0_48, %c0_49] : memref<11x1xf32, #tpu.memory_space<vmem>>, vector<11x1xf32>
      %cst_50 = arith.constant 0.000000e+00 : f32
      %96 = vector.shape_cast %95 : vector<11x1xf32> to vector<11x1xf32>
      %97 = vector.broadcast %96 : vector<11x1xf32> to vector<11x4xf32>
      %98 = vector.broadcast %cst_50 : f32 to vector<11x4xf32>
      %99 = arith.select %94, %97, %98 : vector<11x4xi1>, vector<11x4xf32>
      %c1_i32_51 = arith.constant 1 : i32
      %100 = vector.broadcast %c1_i32_51 : i32 to vector<11x4xi32>
      %101 = arith.cmpi eq, %92, %100 : vector<11x4xi32>
      %c0_52 = arith.constant 0 : index
      %c0_53 = arith.constant 0 : index
      %102 = vector.load %arg7[%c0_52, %c0_53] : memref<11x1xf32, #tpu.memory_space<vmem>>, vector<11x1xf32>
      %cst_54 = arith.constant 0.000000e+00 : f32
      %103 = vector.shape_cast %102 : vector<11x1xf32> to vector<11x1xf32>
      %104 = vector.broadcast %103 : vector<11x1xf32> to vector<11x4xf32>
      %105 = vector.broadcast %cst_54 : f32 to vector<11x4xf32>
      %106 = arith.select %101, %104, %105 : vector<11x4xi1>, vector<11x4xf32>
      %107 = arith.addf %99, %106 : vector<11x4xf32>
      %c2_i32 = arith.constant 2 : i32
      %108 = vector.broadcast %c2_i32 : i32 to vector<11x4xi32>
      %109 = arith.cmpi eq, %92, %108 : vector<11x4xi32>
      %c0_55 = arith.constant 0 : index
      %c0_56 = arith.constant 0 : index
      %110 = vector.load %arg8[%c0_55, %c0_56] : memref<11x1xf32, #tpu.memory_space<vmem>>, vector<11x1xf32>
      %cst_57 = arith.constant 0.000000e+00 : f32
      %111 = vector.shape_cast %110 : vector<11x1xf32> to vector<11x1xf32>
      %112 = vector.broadcast %111 : vector<11x1xf32> to vector<11x4xf32>
      %113 = vector.broadcast %cst_57 : f32 to vector<11x4xf32>
      %114 = arith.select %109, %112, %113 : vector<11x4xi1>, vector<11x4xf32>
      %115 = arith.addf %107, %114 : vector<11x4xf32>
      %c3_i32 = arith.constant 3 : i32
      %116 = vector.broadcast %c3_i32 : i32 to vector<11x4xi32>
      %117 = arith.cmpi eq, %92, %116 : vector<11x4xi32>
      %cst_58 = arith.constant 0.000000e+00 : f32
      %118 = vector.shape_cast %91 : vector<11x1xf32> to vector<11x1xf32>
      %119 = vector.broadcast %118 : vector<11x1xf32> to vector<11x4xf32>
      %120 = vector.broadcast %cst_58 : f32 to vector<11x4xf32>
      %121 = arith.select %117, %119, %120 : vector<11x4xi1>, vector<11x4xf32>
      %122 = arith.addf %115, %121 : vector<11x4xf32>
      %c0_59 = arith.constant 0 : index
      %c0_60 = arith.constant 0 : index
      %c0_61 = arith.constant 0 : index
      %c0_62 = arith.constant 0 : index
      %123 = vector.load %arg5[%c0_59, %c0_60, %c0_61, %c0_62] : memref<1x1x11x4xf32, #tpu.memory_space<vmem>>, vector<1x1x11x4xf32>
      %124 = vector.shape_cast %123 : vector<1x1x11x4xf32> to vector<11x4xf32>
      %125 = vector.shape_cast %122 : vector<11x4xf32> to vector<1x1x11x4xf32>
      tpu.vector_store %arg5[%c0_59, %c0_60, %c0_61, %c0_62], %125 {strides = array<i32>} : memref<1x1x11x4xf32, #tpu.memory_space<vmem>>, vector<1x1x11x4xf32>,
    } else {
    }
    return
  }
  func.func @transform_0(%arg0: i32, %arg1: i32, %arg2: i32) -> (i32, i32, i32) {
    %c1_i32 = arith.constant 1 : i32
    %0 = arith.muli %arg0, %c1_i32 : i32
    %1 = arith.addi %0, %arg2 : i32
    %c0_i32 = arith.constant 0 : i32
    %c0_i32_0 = arith.constant 0 : i32
    return %arg1, %c0_i32, %1 : i32, i32, i32
  }
  func.func @transform_1(%arg0: i32, %arg1: i32, %arg2: i32) -> (i32, i32, i32) {
    %c1_i32 = arith.constant 1 : i32
    %0 = arith.muli %arg0, %c1_i32 : i32
    %1 = arith.addi %0, %arg2 : i32
    %c0_i32 = arith.constant 0 : i32
    %c0_i32_0 = arith.constant 0 : i32
    return %arg1, %c0_i32, %1 : i32, i32, i32
  }
  func.func @transform_2(%arg0: i32, %arg1: i32, %arg2: i32) -> (i32, i32, i32, i32) {
    %c0_i32 = arith.constant 0 : i32
    %c0_i32_0 = arith.constant 0 : i32
    %c0_i32_1 = arith.constant 0 : i32
    return %arg0, %arg1, %c0_i32, %c0_i32_0 : i32, i32, i32, i32
  }
}

</mosaic_0001>

<bundles_post_ra>
// kernel: task_loss.1
= control target key start
LH: loop header
LB: loop body
LE: loop exit
PB: predicated region body
PF: predicated region fallthrough
CT: control target
= control target key end

     0   :  { %s805_s9 = smov 0   ;;  %s807_s10 = smov 0   ;;  %s1021_s0 = inlined_call_operand.vmem [shape: f32[2,11,256], index: 0, kind: input, shape index: {}]   ;;  %s1022_s1 = inlined_call_operand.vmem [shape: s32[2,1,256], index: 1, kind: input, shape index: {}]   ;;  %s1023_s2 = inlined_call_operand.vmem [shape: f32[1,2,11,4], index: 2, kind: output, shape index: {}]  }
   0x1   :  { %s809_s11 = smov 0  }
   0x2 LB: > { %s27_s12 = sadd.s32 1, %s781_s10  ;;  %p701_p0 = scmp.ge.s32.totalorder %s785_s11, 1  ;;  %s785_s11 = sphi %s809_s11, %s12_s11   ;;  %s781_s10 = sphi %s807_s10, %s1029_s10   ;;  %s777_s9 = sphi %s805_s9, %s1028_s9  }
   0x3   : > { %p29_p1 = scmp.ge.s32.totalorder %s27_s12, 2  ;;  %p164_p2 = scmp.lt.s32.totalorder %s785_s11, 3 }
   0x5   : > { %s1031_s12 = smov (%p29_p1, %s27_s12), 0  ;;  %p165_p3 = pnand %p701_p0, %p164_p2 }
   0x6   : > { %p206_p4 = scmp.lt.s32.totalorder (!%p165_p3), %s777_s9, 1  ;;  %v317_v0 = vlaneseq (!%p165_p3)  ;;  %vm240_vm0 = vcmask (!%p165_p3), 7168   ;;  %v787_v1 = vmov (!%p165_p3), 0.0   ;;  %v788_v2 = vmov (!%p165_p3), 0  }
   0x7   : > { %168 = sbr.rel (%p165_p3) target bundleno = 410 (0x19a), region = 28  ;;  %241 = vst.msk [vmem:[#allocation2] sm:$0xff] (!%p165_p3), %vm240_vm0, %v787_v1  ;;  %244 = vst.msk [vmem:[#allocation3] sm:$0xff] (!%p165_p3), %vm240_vm0, %v787_v1  ;;  %745 = vset.pattern.permute.xlu0 (!%p165_p3), %v788_v2  ;;  %746 = vset.pattern.permute.xlu1 (!%p165_p3), %v788_v2  ;;  %vm260_vm1 = vcmask (!%p165_p3), 1042432   ;;  %vm465_vm3 = vcmask (!%p165_p3), 1040384   ;;  %vm248_vm10 = vcmask (!%p165_p3), 0  }
   0x8   : > { %246 = vst.msk [vmem:[#allocation4] sm:$0xff] (!%p165_p3), %vm240_vm0, %v787_v1  ;;  %v834_v3 = vshrl.u32 (!%p165_p3), %v317_v0, 7  ;;  %vm242_vm11 = vcmask (!%p165_p3), 2048  }
   0x9   : > { %250 = vst.msk [vmem:[#allocation6] sm:$0x1] (!%p165_p3), %vm248_vm10, %v787_v1  ;;  %249 = vst.msk [vmem:[#allocation5] sm:$0x1] (!%p165_p3), %vm248_vm10, %v787_v1 }
   0xa   : > { %v848_v9 = vsub.s32 (!%p165_p3), 0, %v834_v3  ;;  %v853_v12 = vsub.s32 (!%p165_p3), 1, %v834_v3  ;;  %v877_v43 = vadd.s32 (!%p165_p3), 8, %v834_v3  ;;  %243 = vst.msk [vmem:[#allocation2 + $0x8] sm:$0x7] (!%p165_p3), %vm242_vm11, %v787_v1  ;;  %vm496_vm12 = vcmp.eq.s32.totalorder (!%p165_p3), %v834_v3, 0 }
   0xb   : > { %245 = vst.msk [vmem:[#allocation3 + $0x8] sm:$0x7] (!%p165_p3), %vm242_vm11, %v787_v1  ;;  %247 = vst.msk [vmem:[#allocation4 + $0x8] sm:$0x7] (!%p165_p3), %vm242_vm11, %v787_v1  ;;  %vm507_vm13 = vcmp.eq.s32.totalorder (!%p165_p3), %v834_v3, 1 }
   0xe   : > { %s1033_s9 = smov (!%p206_p4, %s777_s9), 1 }
   0xf   : > { %s716_s13 = sshll.u32 %s1033_s9, 5  ;;  %s704_s14 = sshll.u32 %s1033_s9, 1 }
  0x10   : > { %s213_s17 = scalar_lea.vmem %s1021_s0, %s716_s13  ;;  %s224_s20 = scalar_lea.vmem %s1022_s1, %s704_s14 }
  0x11   : > { %v844_v4 = vld [vmem:[%s224_s20] sm:$0x3]  ;;  %v257_v6 = vld [vmem:[%s213_s17 + $0x8] sm:$0xff]  ;;  %v258_v7 = vld [vmem:[%s213_s17 + $0x10] sm:$0x7]  ;;  %s717_s21 = sshll.u32 %s1033_s9, 4 }
  0x12   : > { %v256_v5 = vld [vmem:[%s213_s17] sm:$0xff]  ;;  %vm252_vm2 = vcmp.ne.s32.totalorder %v844_v4, 255  ;;  %v259_v8 = vld [vmem:[%s213_s17 + $0x18] sm:$0x7]  ;;  %v261_v10 = vsel %vm260_vm1, %v258_v7, -inf  ;;  %s235_s24 = scalar_lea.vmem %s1023_s2, %s717_s21 }
  0x13   : > { %v269_v11 = vsel %vm260_vm1, %v259_v8, -inf  ;;  %v707_v13 = vsel %vm252_vm2, 1.0, %v787_v1  ;;  %v262_v14 = vmax.f32 %v256_v5, %v261_v10  ;;  %v255_v41 = vsel %vm252_vm2, %v844_v4, 11 }
  0x14   : > { %v270_v15 = vmax.f32 %v257_v6, %v269_v11  ;;  %v479_v16 = vrot.slane %v707_v13, %v848_v9  ;;  %v483_v17 = vrot.slane %v707_v13, %v853_v12  ;;  %v874_v42 = vrot.slane %v255_v41, %v848_v9 }
  0x15   : > { %v263_v18 = vrot.slane %v262_v14, 4  ;;  %v880_v44 = vrot.slane %v255_v41, %v853_v12 }
  0x16   : > { %v271_v19 = vrot.slane %v270_v15, 4  ;;  %v486_v20 = vsel %vm465_vm3, %v479_v16, 0.0  ;;  %v487_v21 = vsel %vm465_vm3, %v483_v17, 0.0  ;;  %vm330_vm4 = vcmp.eq.s32.totalorder %v877_v43, %v874_v42 }
  0x17   : > { %v264_v22 = vmax.f32 %v262_v14, %v263_v18  ;;  %v488_v24 = vadd.f32 %v487_v21, %v486_v20  ;;  %vm331_vm5 = vcmp.eq.s32.totalorder %v877_v43, %v880_v44  ;;  %vm328_vm6 = vcmp.eq.s32.totalorder %v834_v3, %v874_v42 }
  0x18   : > { %v272_v23 = vmax.f32 %v270_v15, %v271_v19  ;;  %v408_v47 = vsel %vm330_vm4, %v258_v7, 0.0  ;;  %vm329_vm7 = vcmp.eq.s32.totalorder %v834_v3, %v880_v44  ;;  %v409_v49 = vsel %vm331_vm5, %v259_v8, 0.0 }
  0x19   : > { %v265_v25 = vrot.slane %v264_v22, 2  ;;  %489 = vadd.xlane.f32.xlu1 %v488_v24  ;;  %v406_v54 = vsel %vm328_vm6, %v256_v5, 0.0  ;;  %v410_v55 = vsel %vm260_vm1, %v408_v47, 0.0  ;;  %v407_v57 = vsel %vm329_vm7, %v257_v6, 0.0 }
  0x1a   : > { %v273_v26 = vrot.slane %v272_v23, 2  ;;  %v418_v58 = vsel %vm260_vm1, %v409_v49, 0.0  ;;  %v411_v61 = vadd.f32 %v410_v55, %v406_v54  ;;  %v789_v24 = vmov 1966171168  }
  0x1b   : > { %v266_v27 = vmax.f32 %v264_v22, %v265_v25  ;;  %v419_v63 = vadd.f32 %v418_v58, %v407_v57  ;;  %v438_v25 = vunpack.c.l.s4 %v789_v24  ;;  %v709_v4 = vsel %vm329_vm7, 1.0, %v787_v1 }
  0x1c   : > { %v274_v28 = vmax.f32 %v272_v23, %v273_v26  ;;  %v412_v11 = vrot.slane %v411_v61, 4 }
  0x1d   : > { %v267_v29 = vrot.slane %v266_v27, 1  ;;  %v420_v13 = vrot.slane %v419_v63, 4 }
  0x1e   : > { %v275_v30 = vrot.slane %v274_v28, 1  ;;  %v413_v17 = vadd.f32 %v412_v11, %v411_v61 }
  0x1f   : > { %v862_v31 = vmax.f32 %v266_v27, %v267_v29  ;;  %v421_v19 = vadd.f32 %v420_v13, %v419_v63  ;;  %v253_v27 = vsel %vm252_vm2, 1, %v788_v2 }
  0x20   : > { %v864_v32 = vmax.f32 %v274_v28, %v275_v30  ;;  %v414_v20 = vrot.slane %v413_v17, 2 }
  0x21   : > { %v277_v33 = vsub.f32 %v256_v5, %v862_v31  ;;  %v279_v35 = vsub.f32 %v258_v7, %v862_v31  ;;  %v422_v21 = vrot.slane %v421_v19, 2 }
  0x22   : > { %v278_v34 = vsub.f32 %v257_v6, %v864_v32  ;;  %v280_v36 = vsub.f32 %v259_v8, %v864_v32  ;;  %v415_v22 = vadd.f32 %v414_v20, %v413_v17 }
  0x23   : > { %v281_v37 = vmul.f32 1.442695, %v277_v33  ;;  %v285_v39 = vmul.f32 1.442695, %v279_v35  ;;  %v423_v23 = vadd.f32 %v422_v21, %v421_v19  ;;  %v711_v19 = vsel %vm331_vm5, 1.0, %v787_v1 }
  0x24   : > { %v283_v38 = vmul.f32 1.442695, %v278_v34  ;;  %v287_v40 = vmul.f32 1.442695, %v280_v36  ;;  %v416_v26 = vrot.slane %v415_v22, 1  ;;  %v361_v36 = vrot.slane %v253_v27, %v848_v9 }
  0x25   : > { %747 = vpow2.f32 %v281_v37  ;;  %v424_v29 = vrot.slane %v423_v23, 1  ;;  %v439_v37 = vunpack.c.0.s8 %v438_v25 }
  0x26   : > { %749 = vpow2.f32 %v283_v38  ;;  %v417_v41 = vadd.f32 %v416_v26, %v415_v22  ;;  %vm924_vm8 = vcmp.eq.s32.totalorder %v361_v36, 1  ;;  %v708_v36 = vsel %vm328_vm6, 1.0, %v787_v1 }
  0x27   : > { %751 = vpow2.f32 %v285_v39  ;;  %v442_v57 = vsub.s32 %v439_v37, %v834_v3 }
  0x28   : > { %753 = vpow2.f32 %v287_v40  ;;  %v365_v40 = vrot.slane %v253_v27, %v853_v12 }
  0x2a   : > { %vm932_vm9 = vcmp.eq.s32.totalorder %v365_v40, 1  ;;  %v352_v40 = vld [vmem:[#allocation3] sm:$0xff] }
  0x2f   : > { %v886_v45 = vpop.eup %747 }
  0x30   : > { %v888_v46 = vpop.eup %749 }
  0x31   : > { %v895_v48 = vpop.eup %751 }
  0x32   : > { %v902_v50 = vpop.eup %753  ;;  %v289_v51 = vsel %vm260_vm1, %v895_v48, 0.0 }
  0x33   : > { %v290_v52 = vadd.f32 %v886_v45, %v289_v51  ;;  %v297_v53 = vsel %vm260_vm1, %v902_v50, 0.0  ;;  %v425_v51 = vadd.f32 %v424_v29, %v423_v23 }
  0x34   : > { %v298_v56 = vadd.f32 %v888_v46, %v297_v53 }
  0x35   : > { %v291_v59 = vrot.slane %v290_v52, 4 }
  0x36   : > { %v299_v60 = vrot.slane %v298_v56, 4 }
  0x37   : > { %v292_v62 = vadd.f32 %v291_v59, %v290_v52 }
  0x38   : > { %v300_v7 = vadd.f32 %v299_v60, %v298_v56 }
  0x39   : > { %v293_v8 = vrot.slane %v292_v62, 2 }
  0x3a   : > { %v301_v10 = vrot.slane %v300_v7, 2 }
  0x3b   : > { %v294_v5 = vadd.f32 %v293_v8, %v292_v62 }
  0x3c   : > { %v302_v14 = vadd.f32 %v301_v10, %v300_v7 }
  0x3d   : > { %v295_v15 = vrot.slane %v294_v5, 1 }
  0x3e   : > { %v303_v16 = vrot.slane %v302_v14, 1 }
  0x3f   : > { %v296_v18 = vadd.f32 %v295_v15, %v294_v5 }
  0x40   : > { %v304_v6 = vadd.f32 %v303_v16, %v302_v14 }
  0x41   : > { %755 = vrcp.f32 %v296_v18 }
  0x42   : > { %757 = vrcp.f32 %v304_v6 }
  0x43   : > { %759 = vlog2.f32 %v296_v18 }
  0x44   : > { %761 = vlog2.f32 %v304_v6 }
  0x4b   : > { %v756_v28 = vpop.eup %755 }
  0x4c   : > { %v758_v30 = vpop.eup %757  ;;  %v307_v33 = vmul.f32 %v756_v28, %v296_v18 }
  0x4d   : > { %v760_v34 = vpop.eup %759  ;;  %v308_v35 = vmul.f32 %v758_v30, %v304_v6 }
  0x4e   : > { %v762_v38 = vpop.eup %761  ;;  %v309_v39 = vsub.f32 2.0, %v307_v33  ;;  %v427_v47 = vmul.f32 0.6931472, %v760_v34 }
  0x4f   : > { %v310_v49 = vsub.f32 2.0, %v308_v35  ;;  %v429_v52 = vmul.f32 0.6931472, %v762_v38  ;;  %v332_v38 = vld [vmem:[#allocation2] sm:$0xff] }
  0x50   : > { %v311_v53 = vmul.f32 %v756_v28, %v309_v39  ;;  %v430_v2 = vadd.f32 %v427_v47, %v862_v31  ;;  %v398_v28 = vsel %vm260_vm1, %v711_v19, 0.0  ;;  %v333_v47 = vld [vmem:[#allocation2 + $0x8] sm:$0x7] }
  0x51   : > { %v312_v54 = vmul.f32 %v758_v30, %v310_v49  ;;  %v431_v56 = vadd.f32 %v429_v52, %v864_v32  ;;  %v710_v32 = vsel %vm330_vm4, 1.0, %v787_v1 }
  0x52   : > { %v313_v58 = vmul.f32 %v886_v45, %v311_v53  ;;  %v315_v59 = vmul.f32 %v895_v48, %v311_v53  ;;  %v432_v61 = vsub.f32 %v430_v2, %v417_v41  ;;  %v397_v27 = vsel %vm260_vm1, %v710_v32, 0.0  ;;  %v353_v53 = vld [vmem:[#allocation3 + $0x8] sm:$0x7] }
  0x53   : > { %v314_v31 = vmul.f32 %v888_v46, %v312_v54  ;;  %v316_v62 = vmul.f32 %v902_v50, %v312_v54  ;;  %v433_v63 = vsub.f32 %v431_v56, %v425_v51  ;;  %v399_v33 = vadd.f32 %v398_v28, %v397_v27  ;;  %v453_v56 = vld [vmem:[#allocation5] sm:$0x1] }
  0x54   : > { %v334_v45 = vsel %vm328_vm6, %v313_v58, 0.0  ;;  %v336_v48 = vsel %vm330_vm4, %v315_v59, 0.0  ;;  %v354_v7 = vmul.f32 %v313_v58, %v313_v58  ;;  %v356_v8 = vmul.f32 %v315_v59, %v315_v59 }
  0x55   : > { %v335_v46 = vsel %vm329_vm7, %v314_v31, 0.0  ;;  %v337_v50 = vsel %vm331_vm5, %v316_v62, 0.0  ;;  %v341_v10 = vsel %vm260_vm1, %v336_v48, 0.0  ;;  %v355_v11 = vmul.f32 %v314_v31, %v314_v31 }
  0x56   : > { %v338_v5 = vadd.f32 %v335_v46, %v334_v45  ;;  %v342_v13 = vsel %vm260_vm1, %v337_v50, 0.0  ;;  %v368_v14 = vsel %vm924_vm8, %v354_v7, 0.0  ;;  %v436_v15 = vcombine.low %v432_v61, %v433_v63 }
  0x57   : > { %v369_v16 = vsel %vm932_vm9, %v355_v11, 0.0  ;;  %v357_v17 = vmul.f32 %v316_v62, %v316_v62  ;;  %v370_v18 = vsel %vm924_vm8, %v356_v8, 0.0  ;;  %v343_v6 = vadd.f32 %v342_v13, %v341_v10  ;;  %v384_v62 = vld [vmem:[#allocation4] sm:$0xff] }
  0x58   : > { %339 = vadd.xlane.f32.xlu0 %v338_v5  ;;  %v372_v20 = vadd.f32 %v369_v16, %v368_v14  ;;  %v443_v21 = vrot.slane %v436_v15, %v442_v57  ;;  %v375_v22 = vsel %vm260_vm1, %v370_v18, 0.0  ;;  %v521_v16 = vand.u32 127, %v317_v0 }
  0x59   : > { %v371_v23 = vsel %vm932_vm9, %v357_v17, 0.0 }
  0x5a   : > { %373 = vadd.xlane.f32.xlu1 %v372_v20  ;;  %v450_v24 = vrot.slane %v443_v21, %v442_v57  ;;  %v376_v25 = vsel %vm260_vm1, %v371_v23, 0.0  ;;  %v385_v57 = vld [vmem:[#allocation4 + $0x8] sm:$0x7]  ;;  %vm537_vm14 = vcmp.eq.s32.totalorder %v521_v16, 1  ;;  %vm522_vm15 = vcmp.eq.s32.totalorder %v521_v16, 0 }
  0x5b   : > { %v377_v26 = vadd.f32 %v376_v25, %v375_v22  ;;  %vm571_vm1 = vcmp.eq.s32.totalorder %v521_v16, 3 }
  0x5c   : > { %344 = vadd.xlane.f32.xlu0 %v343_v6  ;;  %v452_v43 = vsel %vm252_vm2, %v450_v24, 0.0  ;;  %vm586_vm2 = vcmask 31744  }
  0x5d   : > { %v458_v29 = vrot.slane %v452_v43, %v848_v9  ;;  %v462_v30 = vrot.slane %v452_v43, %v853_v12  ;;  %v394_v9 = vadd.f32 %v709_v4, %v708_v36  ;;  %v474_v12 = vld [vmem:[#allocation6] sm:$0x1] }
  0x5e   : > { %378 = vadd.xlane.f32.xlu1 %v377_v26 }
  0x5f   : > { %v466_v34 = vsel %vm465_vm3, %v458_v29, 0.0  ;;  %v467_v35 = vsel %vm465_vm3, %v462_v30, 0.0  ;;  %vm588_vm3 = vcmask 26624  }
  0x60   : > { %v468_v37 = vadd.f32 %v467_v35, %v466_v34 }
  0x62   : > { %469 = vadd.xlane.f32.xlu0 %v468_v37  ;;  %400 = vadd.xlane.f32.xlu1 %v399_v33 }
  0x66   : > { %395 = vadd.xlane.f32.xlu0 %v394_v9 }
  0xa6   : > { %v490_v42 = vpop.xlane.xlu1 %489 }
  0xa7   : > { %v491_v44 = vadd.f32 %v490_v42, %v474_v12 }
  0xa9   : > { %492 = vst.msk [vmem:[#allocation6] sm:$0x1] %vm248_vm10, %v491_v44 }
  0xb0   : > { %v713_v50 = vld [vmem:[#allocation6] ss:$0 sm:$0xff] }
  0xb1   : > { %v516_v5 = vsel %vm507_vm13, %v713_v50, 0.0 }
  0xe5   : > { %v340_v39 = vpop.xlane.xlu0 %339 }
  0xe6   : > { %v346_v41 = vadd.f32 %v340_v39, %v332_v38 }
  0xe7   : > { %v374_v49 = vpop.xlane.xlu1 %373 }
  0xe8   : > { %349 = vst.msk [vmem:[#allocation2] sm:$0xff] %vm240_vm0, %v346_v41  ;;  %v380_v51 = vadd.f32 %v374_v49, %v352_v40 }
  0xe9   : > { %v345_v52 = vpop.xlane.xlu0 %344 }
  0xea   : > { %v347_v2 = vadd.f32 %v345_v52, %v333_v47  ;;  %382 = vst.msk [vmem:[#allocation3] sm:$0xff] %vm240_vm0, %v380_v51 }
  0xeb   : > { %v379_v54 = vpop.xlane.xlu1 %378 }
  0xec   : > { %351 = vst.msk [vmem:[#allocation2 + $0x8] sm:$0x7] %vm242_vm11, %v347_v2  ;;  %v381_v55 = vadd.f32 %v379_v54, %v353_v53 }
  0xee   : > { %383 = vst.msk [vmem:[#allocation3 + $0x8] sm:$0x7] %vm242_vm11, %v381_v55 }
  0xef   : > { %v470_v58 = vpop.xlane.xlu0 %469  ;;  %v523_v59 = vld [vmem:[#allocation2] sm:$0xff]  ;;  %v401_v60 = vpop.xlane.xlu1 %400 }
  0xf0   : > { %v471_v61 = vadd.f32 %v470_v58, %v453_v56  ;;  %527 = vperm.xlu0 %745, %v523_v59   ;;  %v403_v31 = vadd.f32 %v401_v60, %v385_v57 }
  0xf1   : > { %v538_v8 = vld [vmem:[#allocation3] sm:$0xff] }
  0xf2   : > { %473 = vst.msk [vmem:[#allocation5] sm:$0x1] %vm248_vm10, %v471_v61 }
  0xf3   : > { %405 = vst.msk [vmem:[#allocation4 + $0x8] sm:$0x7] %vm242_vm11, %v403_v31  ;;  %v396_v63 = vpop.xlane.xlu0 %395  ;;  %v524_v7 = vld [vmem:[#allocation2 + $0x8] sm:$0x7] }
  0xf4   : > { %v402_v32 = vadd.f32 %v396_v63, %v384_v62 }
  0xf5   : > { %v539_v10 = vld [vmem:[#allocation3 + $0x8] sm:$0x7] }
  0xf6   : > { %404 = vst.msk [vmem:[#allocation4] sm:$0xff] %vm240_vm0, %v402_v32  ;;  %vm554_vm0 = vcmp.eq.s32.totalorder %v521_v16, 2 }
  0xf9   : > { %v712_v46 = vld [vmem:[#allocation5] ss:$0 sm:$0xff] }
  0xfa   : > { %v556_v48 = vld [vmem:[#allocation4 + $0x8] sm:$0x7]  ;;  %v505_v11 = vsel %vm496_vm12, %v712_v46, 0.0 }
  0xfb   : > { %v518_v13 = vadd.f32 %v516_v5, %v505_v11 }
  0xfd   : > { %v555_v45 = vld [vmem:[#allocation4] sm:$0xff] }
  0xfe   : > { %559 = vperm.xlu1 %746, %v555_v45  }
 0x102   : > { %564 = vperm.xlu1 %746, %v556_v48  }
 0x106   : > { %532 = vperm.xlu1 %746, %v524_v7  }
 0x10a   : > { %542 = vperm.xlu1 %746, %v538_v8  }
 0x10e   : > { %547 = vperm.xlu1 %746, %v539_v10  }
 0x112   : > { %574 = vperm.xlu1 %746, %v518_v13  }
 0x116   : > { %579 = vperm.xlu1 %746, %v787_v1  }
 0x16f   : > { %v528_v18 = vpop.permute.xlu0 %527 }
 0x170   : > { %v535_v6 = vsel %vm522_vm15, %v528_v18, 0.0 }
 0x17d   : > { %v560_v14 = vpop.permute.xlu1 %559 }
 0x17e   : > { %v567_v23 = vsel %vm554_vm0, %v560_v14, 0.0 }
 0x181   : > { %v565_v15 = vpop.permute.xlu1 %564 }
 0x182   : > { %v568_v28 = vsel %vm554_vm0, %v565_v15, 0.0 }
 0x185   : > { %v533_v17 = vpop.permute.xlu1 %532 }
 0x186   : > { %v536_v24 = vsel %vm522_vm15, %v533_v17, 0.0 }
 0x189   : > { %v543_v19 = vpop.permute.xlu1 %542 }
 0x18a   : > { %v550_v3 = vsel %vm537_vm14, %v543_v19, 0.0 }
 0x18b   : > { %v552_v20 = vadd.f32 %v550_v3, %v535_v6 }
 0x18d   : > { %v548_v21 = vpop.permute.xlu1 %547  ;;  %v569_v26 = vadd.f32 %v567_v23, %v552_v20 }
 0x18e   : > { %v551_v22 = vsel %vm537_vm14, %v548_v21, 0.0 }
 0x18f   : > { %v553_v1 = vadd.f32 %v551_v22, %v536_v24 }
 0x191   : > { %v575_v25 = vpop.permute.xlu1 %574  ;;  %v570_v43 = vadd.f32 %v568_v28, %v553_v1 }
 0x192   : > { %v582_v0 = vsel %vm571_vm1, %v575_v25, 0.0 }
 0x193   : > { %v584_v27 = vadd.f32 %v582_v0, %v569_v26 }
 0x195   : > { %587 = vst.msk [vmem:[%s235_s24] sm:$0xff] %vm586_vm2, %v584_v27  ;;  %v580_v29 = vpop.permute.xlu1 %579 }
 0x196   : > { %v583_v30 = vsel %vm571_vm1, %v580_v29, 0.0 }
 0x197   : > { %v585_v33 = vadd.f32 %v583_v30, %v570_v43 }
 0x199   : > { %589 = vst.msk [vmem:[%s235_s24 + $0x8] sm:$0x7] %vm588_vm3, %v585_v33 }
 0x19a PF: > { %s12_s11 = sadd.s32 1, %s785_s11   ;;  %s1028_s9 = smov %s781_s10 }
 0x19b   : > { %p9_p5 = scmp.ge.s32.totalorder %s12_s11, 4   ;;  %s1029_s10 = smov %s1031_s12 }
 0x19d   :  { %11 = sbr.rel (!%p9_p5) target bundleno = 2 (0x2), region = 69 }

</bundles_post_ra>
